<compile_context>
chip_gen: v7x
topology: tpu7x:2x2x1
jax: 0.10.0
libtpu: 0.0.40
codegen_flags: <defaults>
</compile_context>

<pallas_src>
import functools

import jax
import jax.numpy as jnp
from jax.experimental import pallas as pl
from jax.experimental.pallas import tpu as pltpu

N_EMBD = 64
HIDDEN = 4 * N_EMBD          # 256
DROPOUT = 0.0                # p=0.0 -> identity; nothing to do in-kernel.

PACK = 2                     # tokens packed per 128-lane row
LANES = PACK * N_EMBD        # 128

# Tokens per grid step (=> block_m // 2 lane-dense rows per tile).
DEFAULT_BLOCK_M = 4096


def _round_up(x, m):
    return (x + m - 1) // m * m


def ffn_kernel(x_ref, w1_ref, b1_ref, w2_ref, b2_ref, o_ref):
    """Fused MLP tile on lane-dense (two-tokens-per-row) data.

    o = relu(x @ W1p + b1p) @ W2p + b2p, where W*p are the 2x2 block-diagonal
    packings of the original weights, so the packed row [tok_even | tok_odd]
    maps straight to [ffn(tok_even) | ffn(tok_odd)] — no in-kernel relayout.
    bf16 MXU operands, f32 accumulation, f32 bias-add / ReLU epilogue.
    """
    x = x_ref[...].astype(jnp.bfloat16)                                  # (tm, 128)
    h = jnp.dot(x, w1_ref[...], preferred_element_type=jnp.float32)      # (tm, 512) f32
    h = jnp.maximum(h + b1_ref[...], 0.0)                                # bias + ReLU in f32
    o = jnp.dot(h.astype(jnp.bfloat16), w2_ref[...],
                preferred_element_type=jnp.float32)                      # (tm, 128) f32
    o_ref[...] = (o + b2_ref[...]).astype(o_ref.dtype)
    # TODO(synk): nonzero dropout would need pltpu.prng_seed / prng_random_bits
    # here; the reference module uses p=0.0, so dropout is the identity.


def _blockdiag2(w):
    """[[w, 0], [0, w]] packing (2x2 block-diagonal)."""
    z = jnp.zeros_like(w)
    top = jnp.concatenate([w, z], axis=1)
    bot = jnp.concatenate([z, w], axis=1)
    return jnp.concatenate([top, bot], axis=0)


@functools.partial(jax.jit, static_argnames=("block_m", "out_dtype"))
def feed_forward(x, w1, b1, w2, b2, *, block_m=DEFAULT_BLOCK_M, out_dtype=None):
    """x: (B, T, C) with C = 64. Returns (B, T, C).

    out_dtype=jnp.bfloat16 halves the writeback traffic (useful on v6e where
    the kernel is HBM-bound) but changes the interface; default keeps x.dtype.
    """
    B, T, C = x.shape
    assert C == N_EMBD
    if out_dtype is None:
        out_dtype = x.dtype
    n_rows = B * T

    x2d = x.reshape(n_rows, C)

    # Pack two tokens per 128-lane row (row-major repack). Only an odd token
    # count needs a 1-row pad so tokens pair up; no whole-tile padding.
    pad = (-n_rows) % PACK
    if pad:
        x2d = jnp.pad(x2d, ((0, pad), (0, 0)))
    n2 = (n_rows + pad) // PACK
    xd = x2d.reshape(n2, LANES)

    # Resident packed weights as bf16 (~0.5 MiB total): feeds the MXU's native
    # single-pass bf16 path for BOTH GEMMs. Biases stay f32 for the epilogue.
    w1p = _blockdiag2(w1.astype(jnp.bfloat16))          # (128, 512) bf16
    w2p = _blockdiag2(w2.astype(jnp.bfloat16))          # (512, 128) bf16
    b1p = jnp.concatenate([b1, b1], axis=1)             # (1, 512) f32
    b2p = jnp.concatenate([b2, b2], axis=1)             # (1, 128) f32

    # Row tile (in packed rows): multiple of 8 sublanes, no larger than needed.
    tm = max(8, min(block_m // PACK, _round_up(n2, 8)))
    tm = _round_up(tm, 8)
    grid = (pl.cdiv(n2, tm),)                           # ragged last tile is masked

    out = pl.pallas_call(
        ffn_kernel,
        out_shape=jax.ShapeDtypeStruct((n2, LANES), out_dtype),
        grid_spec=pltpu.PrefetchScalarGridSpec(
            num_scalar_prefetch=0,
            grid=grid,
            in_specs=[
                pl.BlockSpec((tm, LANES), lambda i: (i, 0)),                     # x rows (pipelined)
                pl.BlockSpec((PACK * N_EMBD, PACK * HIDDEN), lambda i: (0, 0)),  # w1p (resident)
                pl.BlockSpec((1, PACK * HIDDEN), lambda i: (0, 0)),              # b1p
                pl.BlockSpec((PACK * HIDDEN, PACK * N_EMBD), lambda i: (0, 0)),  # w2p (resident)
                pl.BlockSpec((1, PACK * N_EMBD), lambda i: (0, 0)),              # b2p
            ],
            out_specs=pl.BlockSpec((tm, LANES), lambda i: (i, 0)),
        ),
        compiler_params=pltpu.CompilerParams(
            # Token tiles are independent -> shard grid steps across TCs.
            dimension_semantics=("parallel",),
            # Lifts the 16 MiB scoped default on v5e, leaves sweep headroom on
            # v6e, and stays safely under v7x's 64 MiB physical VMEM per TC.
            vmem_limit_bytes=48 * 1024 * 1024,
        ),
    )(xd, w1p, b1p, w2p, b2p)

    out = out.reshape(n2 * PACK, C)
    if pad:
        out = out[:n_rows]
    return out.reshape(B, T, C)


def init_params(key):
    """Deterministic parameter init (shapes match nn.Linear in the module)."""
    k1, k2, k3, k4 = jax.random.split(key, 4)
    # Same uniform bound convention as torch.nn.Linear: U(-1/sqrt(fan_in), ...)
    bound1 = 1.0 / (N_EMBD ** 0.5)
    bound2 = 1.0 / (HIDDEN ** 0.5)
    w1 = jax.random.uniform(k1, (N_EMBD, HIDDEN), jnp.float32, -bound1, bound1)
    b1 = jax.random.uniform(k2, (1, HIDDEN), jnp.float32, -bound1, bound1)
    w2 = jax.random.uniform(k3, (HIDDEN, N_EMBD), jnp.float32, -bound2, bound2)
    b2 = jax.random.uniform(k4, (1, N_EMBD), jnp.float32, -bound2, bound2)
    return w1, b1, w2, b2


def feed_forward_ref(x, w1, b1, w2, b2):
    """Pure-f32 reference (matches the PyTorch module exactly)."""
    h = jnp.maximum(x @ w1 + b1[0], 0.0)
    return h @ w2 + b2[0]


def feed_forward_ref_bf16(x, w1, b1, w2, b2):
    """Matching-precision reference (bf16 operands, f32 accumulation)."""
    xb = x.astype(jnp.bfloat16)
    h = jnp.dot(xb, w1.astype(jnp.bfloat16), preferred_element_type=jnp.float32)
    h = jnp.maximum(h + b1[0], 0.0)
    o = jnp.dot(h.astype(jnp.bfloat16), w2.astype(jnp.bfloat16),
                preferred_element_type=jnp.float32)
    return o + b2[0]


if __name__ == "__main__":
    key = jax.random.PRNGKey(0)
    kx, kp = jax.random.split(key)

    B, T = 2, 8
    x = jax.random.normal(kx, (B, T, N_EMBD), jnp.float32)
    w1, b1, w2, b2 = init_params(kp)

    out = jax.block_until_ready(feed_forward(x, w1, b1, w2, b2))
    assert out.shape == (B, T, N_EMBD)

    ref16 = feed_forward_ref_bf16(x, w1, b1, w2, b2)
    ref32 = feed_forward_ref(x, w1, b1, w2, b2)
    assert jnp.allclose(out, ref16, atol=5e-3, rtol=5e-3)   # tight, same precision
    assert jnp.allclose(out, ref32, atol=3e-2, rtol=3e-2)   # vs exact f32 module

    # Ragged case: 21 tokens (odd -> 1-row pack pad), tiny tile -> multi-step
    # grid whose last block is a masked boundary block.
    x2 = jax.random.normal(jax.random.PRNGKey(1), (3, 7, N_EMBD), jnp.float32)
    out2 = jax.block_until_ready(feed_forward(x2, w1, b1, w2, b2, block_m=16))
    ref2 = feed_forward_ref(x2, w1, b1, w2, b2)
    assert out2.shape == (3, 7, N_EMBD)
    assert jnp.allclose(out2, ref2, atol=3e-2, rtol=3e-2)

    print("KERNEL_OK")
</pallas_src>

<mosaic_0001>
module attributes {stable_mosaic.version = 11 : i64} {
  func.func @ffn_kernel(%arg0: i32, %arg1: memref<8x128xf32, #tpu.memory_space<vmem>>, %arg2: memref<128x512xbf16, #tpu.memory_space<vmem>>, %arg3: memref<1x512xf32, #tpu.memory_space<vmem>>, %arg4: memref<512x128xbf16, #tpu.memory_space<vmem>>, %arg5: memref<1x128xf32, #tpu.memory_space<vmem>>, %arg6: memref<8x128xf32, #tpu.memory_space<vmem>>) attributes {dimension_semantics = [#tpu.dimension_semantics<parallel>], iteration_bounds = array<i64: 1>, scalar_prefetch = 0 : i64, scratch_operands = 0 : i64, tpu.core_type = #tpu.core_type<tc>, window_params = [{transform_indices = @transform_0, window_bounds = array<i64: 8, 128>}, {pipeline_mode = #tpu.pipeline_mode<synchronous>, transform_indices = @transform_1, window_bounds = array<i64: 128, 512>}, {pipeline_mode = #tpu.pipeline_mode<synchronous>, transform_indices = @transform_2, window_bounds = array<i64: 1, 512>}, {pipeline_mode = #tpu.pipeline_mode<synchronous>, transform_indices = @transform_3, window_bounds = array<i64: 512, 128>}, {pipeline_mode = #tpu.pipeline_mode<synchronous>, transform_indices = @transform_4, window_bounds = array<i64: 1, 128>}, {transform_indices = @transform_5, window_bounds = array<i64: 8, 128>}]} {
    %c0 = arith.constant 0 : index
    %c0_0 = arith.constant 0 : index
    %0 = vector.load %arg1[%c0, %c0_0] : memref<8x128xf32, #tpu.memory_space<vmem>>, vector<8x128xf32>
    %1 = arith.truncf %0 : vector<8x128xf32> to vector<8x128xbf16>
    %c0_1 = arith.constant 0 : index
    %c0_2 = arith.constant 0 : index
    %2 = vector.load %arg2[%c0_1, %c0_2] : memref<128x512xbf16, #tpu.memory_space<vmem>>, vector<128x512xbf16>
    %cst = arith.constant dense<0.000000e+00> : vector<8x512xf32>
    %3 = tpu.matmul %1, %2, %cst {dimension_numbers = #tpu.dot_dimension_numbers<[1], [0], [0], [1], [0, 0, 1, 1], [], []>} : vector<8x128xbf16>, vector<128x512xbf16>, vector<8x512xf32> -> vector<8x512xf32>
    %c0_3 = arith.constant 0 : index
    %c0_4 = arith.constant 0 : index
    %4 = vector.load %arg3[%c0_3, %c0_4] : memref<1x512xf32, #tpu.memory_space<vmem>>, vector<1x512xf32>
    %5 = vector.broadcast %4 : vector<1x512xf32> to vector<8x512xf32>
    %6 = arith.addf %3, %5 : vector<8x512xf32>
    %cst_5 = arith.constant 0.000000e+00 : f32
    %7 = vector.broadcast %cst_5 : f32 to vector<8x512xf32>
    %8 = arith.maximumf %6, %7 : vector<8x512xf32>
    %9 = arith.truncf %8 : vector<8x512xf32> to vector<8x512xbf16>
    %c0_6 = arith.constant 0 : index
    %c0_7 = arith.constant 0 : index
    %10 = vector.load %arg4[%c0_6, %c0_7] : memref<512x128xbf16, #tpu.memory_space<vmem>>, vector<512x128xbf16>
    %cst_8 = arith.constant dense<0.000000e+00> : vector<8x128xf32>
    %11 = tpu.matmul %9, %10, %cst_8 {dimension_numbers = #tpu.dot_dimension_numbers<[1], [0], [0], [1], [0, 0, 1, 1], [], []>} : vector<8x512xbf16>, vector<512x128xbf16>, vector<8x128xf32> -> vector<8x128xf32>
    %c0_9 = arith.constant 0 : index
    %c0_10 = arith.constant 0 : index
    %12 = vector.load %arg5[%c0_9, %c0_10] : memref<1x128xf32, #tpu.memory_space<vmem>>, vector<1x128xf32>
    %13 = vector.broadcast %12 : vector<1x128xf32> to vector<8x128xf32>
    %14 = arith.addf %11, %13 : vector<8x128xf32>
    %c0_11 = arith.constant 0 : index
    %c0_12 = arith.constant 0 : index
    %15 = vector.load %arg6[%c0_11, %c0_12] : memref<8x128xf32, #tpu.memory_space<vmem>>, vector<8x128xf32>
    tpu.vector_store %arg6[%c0_11, %c0_12], %14 {strides = array<i32>} : memref<8x128xf32, #tpu.memory_space<vmem>>, vector<8x128xf32>,
    return
  }
  func.func @transform_0(%arg0: i32) -> (i32, i32) {
    %c0_i32 = arith.constant 0 : i32
    %c0_i32_0 = arith.constant 0 : i32
    return %arg0, %c0_i32 : i32, i32
  }
  func.func @transform_1(%arg0: i32) -> (i32, i32) {
    %c0_i32 = arith.constant 0 : i32
    %c0_i32_0 = arith.constant 0 : i32
    %c0_i32_1 = arith.constant 0 : i32
    return %c0_i32, %c0_i32_0 : i32, i32
  }
  func.func @transform_2(%arg0: i32) -> (i32, i32) {
    %c0_i32 = arith.constant 0 : i32
    %c0_i32_0 = arith.constant 0 : i32
    %c0_i32_1 = arith.constant 0 : i32
    return %c0_i32, %c0_i32_0 : i32, i32
  }
  func.func @transform_3(%arg0: i32) -> (i32, i32) {
    %c0_i32 = arith.constant 0 : i32
    %c0_i32_0 = arith.constant 0 : i32
    %c0_i32_1 = arith.constant 0 : i32
    return %c0_i32, %c0_i32_0 : i32, i32
  }
  func.func @transform_4(%arg0: i32) -> (i32, i32) {
    %c0_i32 = arith.constant 0 : i32
    %c0_i32_0 = arith.constant 0 : i32
    %c0_i32_1 = arith.constant 0 : i32
    return %c0_i32, %c0_i32_0 : i32, i32
  }
  func.func @transform_5(%arg0: i32) -> (i32, i32) {
    %c0_i32 = arith.constant 0 : i32
    %c0_i32_0 = arith.constant 0 : i32
    return %arg0, %c0_i32 : i32, i32
  }
}

</mosaic_0001>

<bundles_post_ra>
// kernel: feed_forward.1
= control target key start
LH: loop header
LB: loop body
LE: loop exit
PB: predicated region body
PF: predicated region fallthrough
CT: control target
= control target key end

     0   :  { %v865_v1 = vmov 0   ;;  %s1100_s1 = inlined_call_operand.vmem [shape: bf16[128,512], index: 1, kind: input, shape index: {}]   ;;  %s1101_s3 = inlined_call_operand.vmem [shape: bf16[512,128], index: 3, kind: input, shape index: {}]   ;;  %s1102_s0 = inlined_call_operand.vmem [shape: f32[8,128], index: 0, kind: input, shape index: {}]   ;;  %s1103_s2 = inlined_call_operand.vmem [shape: f32[1,512], index: 2, kind: input, shape index: {}]   ;;  %s1104_s4 = inlined_call_operand.vmem [shape: f32[1,128], index: 4, kind: input, shape index: {}]   ;;  %s1105_s5 = inlined_call_operand.vmem [shape: f32[8,128], index: 5, kind: output, shape index: {}]  }
   0x1   :  { %v785_v0 = vld [vmem:[%s1100_s1 + $0x4] ss:$16 sps:$4 sm:$0xff]   ;;  %269 = vmatprep.mubr.bf16.mxu0 %v865_v1  ;;  %310 = vmatprep.mubr.bf16.mxu1 %v865_v1  ;;  %v787_v2 = vld [vmem:[%s1100_s1 + $0xc] ss:$16 sps:$4 sm:$0xff]   ;;  %v789_v3 = vld [vmem:[%s1100_s1] ss:$16 sps:$4 sm:$0xff]  }
   0x2   :  { %237 = vmatprep.subr.bf16.mxu0 %v785_v0  ;;  %v790_v4 = vld [vmem:[%s1100_s1 + $0x8] ss:$16 sps:$4 sm:$0xff]   ;;  %278 = vmatprep.subr.bf16.mxu1 %v787_v2  ;;  %v791_v5 = vld [vmem:[%s1100_s1 + $0x24] ss:$16 sps:$4 sm:$0xff]   ;;  %v793_v6 = vld [vmem:[%s1100_s1 + $0x2c] ss:$16 sps:$4 sm:$0xff]  }
   0x3   :  { %238 = vmatpush1.bf16.msra.mxu0 %v789_v3  ;;  %279 = vmatpush1.bf16.msra.mxu1 %v790_v4  ;;  %v795_v7 = vld [vmem:[%s1100_s1 + $0x20] ss:$16 sps:$4 sm:$0xff]   ;;  %v796_v8 = vld [vmem:[%s1100_s1 + $0x28] ss:$16 sps:$4 sm:$0xff]   ;;  %v797_v9 = vld [vmem:[%s1100_s1 + $0x44] ss:$16 sps:$4 sm:$0xff]   ;;  %v57_v3 = vlaneseq }
   0x4   :  { %239 = vmatprep.subr.bf16.mxu0 %v791_v5  ;;  %280 = vmatprep.subr.bf16.mxu1 %v793_v6  ;;  %v799_v10 = vld [vmem:[%s1100_s1 + $0x4c] ss:$16 sps:$4 sm:$0xff]   ;;  %v801_v11 = vld [vmem:[%s1100_s1 + $0x40] ss:$16 sps:$4 sm:$0xff]   ;;  %v802_v12 = vld [vmem:[%s1100_s1 + $0x48] ss:$16 sps:$4 sm:$0xff]  }
   0x5   :  { %v803_v13 = vld [vmem:[%s1100_s1 + $0x64] ss:$16 sps:$4 sm:$0xff]   ;;  %v805_v14 = vld [vmem:[%s1100_s1 + $0x6c] ss:$16 sps:$4 sm:$0xff]   ;;  %v807_v15 = vld [vmem:[%s1100_s1 + $0x60] ss:$16 sps:$4 sm:$0xff]  }
   0x6   :  { %v808_v16 = vld [vmem:[%s1100_s1 + $0x68] ss:$16 sps:$4 sm:$0xff]   ;;  %v809_v17 = vld [vmem:[%s1100_s1 + $0x84] ss:$16 sps:$4 sm:$0xff]   ;;  %v811_v18 = vld [vmem:[%s1100_s1 + $0x8c] ss:$16 sps:$4 sm:$0xff]  }
   0x7   :  { %240 = vmatpush1.bf16.msra.mxu0 %v795_v7  ;;  %281 = vmatpush1.bf16.msra.mxu1 %v796_v8  ;;  %v813_v19 = vld [vmem:[%s1100_s1 + $0x80] ss:$16 sps:$4 sm:$0xff]   ;;  %v814_v20 = vld [vmem:[%s1100_s1 + $0x88] ss:$16 sps:$4 sm:$0xff]   ;;  %v815_v21 = vld [vmem:[%s1100_s1 + $0xa4] ss:$16 sps:$4 sm:$0xff]  }
   0x8   :  { %241 = vmatprep.subr.bf16.mxu0 %v797_v9  ;;  %282 = vmatprep.subr.bf16.mxu1 %v799_v10  ;;  %v817_v22 = vld [vmem:[%s1100_s1 + $0xac] ss:$16 sps:$4 sm:$0xff]   ;;  %v819_v23 = vld [vmem:[%s1100_s1 + $0xa0] ss:$16 sps:$4 sm:$0xff]   ;;  %v820_v24 = vld [vmem:[%s1100_s1 + $0xa8] ss:$16 sps:$4 sm:$0xff]  }
   0x9   :  { %v821_v25 = vld [vmem:[%s1100_s1 + $0xc4] ss:$16 sps:$4 sm:$0xff]   ;;  %v823_v26 = vld [vmem:[%s1100_s1 + $0xcc] ss:$16 sps:$4 sm:$0xff]   ;;  %v825_v27 = vld [vmem:[%s1100_s1 + $0xc0] ss:$16 sps:$4 sm:$0xff]  }
   0xa   :  { %v826_v28 = vld [vmem:[%s1100_s1 + $0xc8] ss:$16 sps:$4 sm:$0xff]   ;;  %v827_v29 = vld [vmem:[%s1100_s1 + $0xe4] ss:$16 sps:$4 sm:$0xff]   ;;  %v829_v30 = vld [vmem:[%s1100_s1 + $0xec] ss:$16 sps:$4 sm:$0xff]  }
   0xb   :  { %242 = vmatpush1.bf16.msra.mxu0 %v801_v11  ;;  %283 = vmatpush1.bf16.msra.mxu1 %v802_v12  ;;  %v831_v31 = vld [vmem:[%s1100_s1 + $0xe0] ss:$16 sps:$4 sm:$0xff]   ;;  %v832_v32 = vld [vmem:[%s1100_s1 + $0xe8] ss:$16 sps:$4 sm:$0xff]   ;;  %v58_v4 = vshrl.u32 %v57_v3, 7 }
   0xc   :  { %243 = vmatprep.subr.bf16.mxu0 %v803_v13  ;;  %284 = vmatprep.subr.bf16.mxu1 %v805_v14  ;;  %v21_v33 = vld [vmem:[%s1102_s0] sm:$0xff]  ;;  %v837_v39 = vld [vmem:[%s1101_s3 + $0x48] sm:$0xff]   ;;  %v841_v43 = vld [vmem:[%s1101_s3 + $0x50] sm:$0xff]  }
   0xd   :  { %v833_v34 = vld [vmem:[%s1101_s3 + $0x40] sm:$0xff]   ;;  %v22_v37 = vpack.c.bf16 %v21_v33, %v21_v33  ;;  %v838_v40 = vld [vmem:[%s1101_s3 + $0xc8] sm:$0xff]   ;;  %v842_v44 = vld [vmem:[%s1101_s3 + $0xd0] sm:$0xff]   ;;  %v59_v5 = vsub.s32 0, %v58_v4  ;;  %v67_v6 = vsub.s32 2, %v58_v4  ;;  %v63_v8 = vsub.s32 1, %v58_v4 }
   0xe   :  { %v834_v35 = vld [vmem:[%s1101_s3 + $0xc0] sm:$0xff]   ;;  %v839_v41 = vld [vmem:[%s1101_s3 + $0x8] sm:$0xff]   ;;  %v843_v45 = vld [vmem:[%s1101_s3 + $0x10] sm:$0xff]   ;;  %v71_v9 = vsub.s32 3, %v58_v4 }
   0xf   :  { %244 = vmatpush1.bf16.msra.mxu0 %v807_v15  ;;  %285 = vmatpush1.bf16.msra.mxu1 %v808_v16  ;;  %v835_v36 = vld [vmem:[%s1101_s3] sm:$0xff]   ;;  %v840_v42 = vld [vmem:[%s1101_s3 + $0x88] sm:$0xff]   ;;  %v844_v46 = vld [vmem:[%s1101_s3 + $0x90] sm:$0xff]  }
  0x10   :  { %245 = vmatprep.subr.bf16.mxu0 %v809_v17  ;;  %286 = vmatprep.subr.bf16.mxu1 %v811_v18  ;;  %v836_v38 = vld [vmem:[%s1101_s3 + $0x80] sm:$0xff]   ;;  %v845_v47 = vld [vmem:[%s1101_s3 + $0x58] sm:$0xff]   ;;  %v853_v55 = vld [vmem:[%s1101_s3 + $0x68] sm:$0xff]  }
  0x11   :  { %v846_v48 = vld [vmem:[%s1101_s3 + $0xd8] sm:$0xff]   ;;  %v849_v51 = vld [vmem:[%s1101_s3 + $0x60] sm:$0xff]   ;;  %v854_v56 = vld [vmem:[%s1101_s3 + $0xe8] sm:$0xff]  }
  0x12   :  { %v847_v49 = vld [vmem:[%s1101_s3 + $0x18] sm:$0xff]   ;;  %v850_v52 = vld [vmem:[%s1101_s3 + $0xe0] sm:$0xff]   ;;  %v855_v57 = vld [vmem:[%s1101_s3 + $0x28] sm:$0xff]  }
  0x13   :  { %246 = vmatpush1.bf16.msra.mxu0 %v813_v19  ;;  %287 = vmatpush1.bf16.msra.mxu1 %v814_v20  ;;  %v848_v50 = vld [vmem:[%s1101_s3 + $0x98] sm:$0xff]   ;;  %v851_v53 = vld [vmem:[%s1101_s3 + $0x20] sm:$0xff]   ;;  %v856_v58 = vld [vmem:[%s1101_s3 + $0xa8] sm:$0xff]  }
  0x14   :  { %247 = vmatprep.subr.bf16.mxu0 %v815_v21  ;;  %288 = vmatprep.subr.bf16.mxu1 %v817_v22  ;;  %v852_v54 = vld [vmem:[%s1101_s3 + $0xa0] sm:$0xff]   ;;  %v857_v59 = vld [vmem:[%s1101_s3 + $0x70] sm:$0xff]   ;;  %v861_v63 = vld [vmem:[%s1101_s3 + $0x78] sm:$0xff]  }
  0x15   :  { %v858_v60 = vld [vmem:[%s1101_s3 + $0xf0] sm:$0xff]   ;;  %v862_v0 = vld [vmem:[%s1101_s3 + $0xf8] sm:$0xff]   ;;  %v55_v7 = vld [vmem:[%s1103_s2] sm:$0xf] }
  0x16   :  { %v859_v61 = vld [vmem:[%s1101_s3 + $0x30] sm:$0xff]   ;;  %v863_v1 = vld [vmem:[%s1101_s3 + $0x38] sm:$0xff]   ;;  %v60_v10 = vrot.slane %v55_v7, %v59_v5  ;;  %v68_v11 = vrot.slane %v55_v7, %v67_v6  ;;  %v64_v12 = vrot.slane %v55_v7, %v63_v8  ;;  %v72_v13 = vrot.slane %v55_v7, %v71_v9 }
  0x17   :  { %248 = vmatpush1.bf16.msra.mxu0 %v819_v23  ;;  %289 = vmatpush1.bf16.msra.mxu1 %v820_v24  ;;  %v860_v62 = vld [vmem:[%s1101_s3 + $0xb0] sm:$0xff]   ;;  %v864_v2 = vld [vmem:[%s1101_s3 + $0xb8] sm:$0xff]  }
  0x18   :  { %249 = vmatprep.subr.bf16.mxu0 %v821_v25  ;;  %290 = vmatprep.subr.bf16.mxu1 %v823_v26 }
  0x1b   :  { %250 = vmatpush1.bf16.msra.mxu0 %v825_v27  ;;  %291 = vmatpush1.bf16.msra.mxu1 %v826_v28 }
  0x1c   :  { %251 = vmatprep.subr.bf16.mxu0 %v827_v29  ;;  %292 = vmatprep.subr.bf16.mxu1 %v829_v30 }
  0x1f   :  { %252 = vmatpush1.bf16.msra.mxu0 %v831_v31  ;;  %293 = vmatpush1.bf16.msra.mxu1 %v832_v32 }
  0x20   :  { %740 = vmatprep.subr.bf16.mxu0 %v833_v34  ;;  %762 = vmatprep.subr.bf16.mxu1 %v834_v35 }
  0x22   :  { %270 = vmatmul.mubr.bf16.vlgmr.msra.gmra.mrb[0].mxu0 %v22_v37  ;;  %311 = vmatmul.mubr.bf16.vlgmr.msra.gmra.mrb[0].mxu1 %v22_v37 }
  0x23   :  { %741 = vmatpush3.bf16.msra.mxu0 %v835_v36  ;;  %763 = vmatpush3.bf16.msra.mxu1 %v836_v38  ;;  %v707_v36 = vld [vmem:[%s1104_s4] ss:$0 sm:$0xff] }
  0x24   :  { %742 = vmatprep.subr.bf16.mxu0 %v837_v39  ;;  %764 = vmatprep.subr.bf16.mxu1 %v838_v40 }
  0x27   :  { %743 = vmatpush3.bf16.msra.mxu0 %v839_v41  ;;  %765 = vmatpush3.bf16.msra.mxu1 %v840_v42 }
  0x28   :  { %744 = vmatprep.subr.bf16.mxu0 %v841_v43  ;;  %766 = vmatprep.subr.bf16.mxu1 %v842_v44 }
  0x2b   :  { %745 = vmatpush3.bf16.msra.mxu0 %v843_v45  ;;  %767 = vmatpush3.bf16.msra.mxu1 %v844_v46 }
  0x2c   :  { %746 = vmatprep.subr.bf16.mxu0 %v845_v47  ;;  %768 = vmatprep.subr.bf16.mxu1 %v846_v48 }
  0x2f   :  { %747 = vmatpush3.bf16.msra.mxu0 %v847_v49  ;;  %769 = vmatpush3.bf16.msra.mxu1 %v848_v50 }
  0x30   :  { %748 = vmatprep.subr.bf16.mxu0 %v849_v51  ;;  %770 = vmatprep.subr.bf16.mxu1 %v850_v52 }
  0x33   :  { %749 = vmatpush3.bf16.msra.mxu0 %v851_v53  ;;  %771 = vmatpush3.bf16.msra.mxu1 %v852_v54 }
  0x34   :  { %750 = vmatprep.subr.bf16.mxu0 %v853_v55  ;;  %772 = vmatprep.subr.bf16.mxu1 %v854_v56 }
  0x37   :  { %751 = vmatpush3.bf16.msra.mxu0 %v855_v57  ;;  %773 = vmatpush3.bf16.msra.mxu1 %v856_v58 }
  0x38   :  { %752 = vmatprep.subr.bf16.mxu0 %v857_v59  ;;  %774 = vmatprep.subr.bf16.mxu1 %v858_v60 }
  0x3b   :  { %753 = vmatpush3.bf16.msra.mxu0 %v859_v61  ;;  %775 = vmatpush3.bf16.msra.mxu1 %v860_v62 }
  0x3c   :  { %754 = vmatprep.subr.bf16.mxu0 %v861_v63  ;;  %776 = vmatprep.subr.bf16.mxu1 %v862_v0 }
  0x3f   :  { %755 = vmatpush3.bf16.msra.mxu0 %v863_v1  ;;  %777 = vmatpush3.bf16.msra.mxu1 %v864_v2 }
  0xf5   :  { %v271_v14 = vpop.f32.mrb[0].mxu0  ;;  %v312_v15 = vpop.f32.mrb[0].mxu1 }
  0xf6   :  { %v272_v16 = vadd.f32 %v271_v14, %v60_v10  ;;  %v313_v17 = vadd.f32 %v312_v15, %v68_v11  ;;  %v273_v18 = vpop.f32.mrb[1].mxu0  ;;  %v314_v19 = vpop.f32.mrb[1].mxu1 }
  0xf7   :  { %v274_v20 = vadd.f32 %v273_v18, %v64_v12  ;;  %v315_v21 = vadd.f32 %v314_v19, %v72_v13  ;;  %v275_v22 = vpop.f32.mrb[2].mxu0  ;;  %v316_v23 = vpop.f32.mrb[2].mxu1 }
  0xf8   :  { %v319_v24 = vmax.f32 %v272_v16, 0.0  ;;  %v321_v25 = vmax.f32 %v313_v17, 0.0  ;;  %v276_v26 = vpop.f32.mrb[3].mxu0  ;;  %v317_v27 = vpop.f32.mrb[3].mxu1 }
  0xf9   :  { %v320_v28 = vmax.f32 %v274_v20, 0.0  ;;  %v322_v29 = vmax.f32 %v315_v21, 0.0 }
  0xfa   :  { %v325_v30 = vpack.c.bf16 %v321_v25, %v321_v25  ;;  %v323_v33 = vpack.c.bf16 %v319_v24, %v319_v24 }
  0xfb   :  { %v324_v31 = vpack.c.bf16 %v320_v28, %v320_v28  ;;  %v326_v32 = vpack.c.bf16 %v322_v29, %v322_v29 }
  0xfd   :  { %622 = vmatprep.mubr.bf16.mxu0 %v324_v31  ;;  %662 = vmatprep.mubr.bf16.mxu1 %v326_v32 }
  0xfe   :  { %623 = vmatmul.mubr.bf16.vlgmr.msra.gmra.mrb[4].mxu0 %v323_v33  ;;  %663 = vmatmul.mubr.bf16.vlgmr.msra.gmra.mrb[4].mxu1 %v325_v30 }
 0x1d1   :  { %v756_v34 = vpop.f32.mrb[4].mxu0  ;;  %v778_v35 = vpop.f32.mrb[4].mxu1 }
 0x1d2   :  { %v757_v37 = vpop.f32.mrb[5].mxu0  ;;  %v779_v38 = vpop.f32.mrb[5].mxu1 }
 0x1d3   :  { %v758_v39 = vadd.f32 %v757_v37, %v756_v34  ;;  %v780_v40 = vadd.f32 %v779_v38, %v778_v35  ;;  %v759_v41 = vpop.f32.mrb[6].mxu0  ;;  %v781_v42 = vpop.f32.mrb[6].mxu1 }
 0x1d4   :  { %v760_v43 = vpop.f32.mrb[7].mxu0  ;;  %v782_v44 = vpop.f32.mrb[7].mxu1 }
 0x1d5   :  { %v625_v45 = vadd.f32 %v758_v39, %v707_v36 }
 0x1d7   :  { %v665_v46 = vadd.f32 %v780_v40, %v625_v45 }
 0x1d9   :  { %670 = vst [vmem:[%s1105_s5] sm:$0xff] %v665_v46 }

</bundles_post_ra>
